<compile_context>
chip_gen: v7x
topology: tpu7x:2x2x1
jax: 0.10.0
libtpu: 0.0.40
codegen_flags: <defaults>
</compile_context>

<pallas_src>
import functools
import math

import jax
import jax.numpy as jnp
import numpy as np
from jax import lax
from jax.experimental import pallas as pl
from jax.experimental.pallas import tpu as pltpu

# ---------------------------------------------------------------------------
# Tiling / compiler knobs
# ---------------------------------------------------------------------------
TM = 512          # row tile for MXU matmuls
DW_TH = 32        # output-row tile for the depthwise conv (multiple of 4)


def _default_vmem_limit():
    # ~5/8 of physical VMEM: ~80 MiB on v5e/v6e (128 MiB), ~40 MiB on v7x (64 MiB).
    try:
        cap = int(pltpu.get_tpu_info().vmem_capacity_bytes)
    except Exception:
        cap = 64 * 1024 * 1024
    return max(32 * 1024 * 1024, min(cap * 5 // 8, 96 * 1024 * 1024))


VMEM_LIMIT = _default_vmem_limit()


def _sigmoid(x):
    # Exact: sigmoid(x) = 0.5*tanh(0.5*x) + 0.5  (single EUP op per element).
    return 0.5 * jnp.tanh(0.5 * x) + 0.5


def _silu(x):
    return x * _sigmoid(x)


def _full_spec(shape):
    # single resident VMEM block, same for every grid step
    return pl.BlockSpec(shape, lambda *_: (0,) * len(shape))


# ---------------------------------------------------------------------------
# Flattened (batch-merged) matmul: 1x1 conv / stem im2col, fused bias (+SiLU)
# ---------------------------------------------------------------------------
def _mm_flat_kernel(x_ref, w_ref, b_ref, o_ref, *, act):
    acc = jnp.dot(x_ref[...], w_ref[...],
                  preferred_element_type=jnp.float32) + b_ref[...]
    if act == "silu":
        acc = _silu(acc)
    o_ref[...] = acc.astype(o_ref.dtype)


def _matmul_flat(x2, w, b, act):
    # x2: (R, K) bf16; w: (K, Cout) bf16; b: (1, Cout) f32
    R, K = x2.shape
    Cout = w.shape[1]
    tm = min(TM, R)
    grid = (pl.cdiv(R, tm),)
    return pl.pallas_call(
        functools.partial(_mm_flat_kernel, act=act),
        grid=grid,
        out_shape=jax.ShapeDtypeStruct((R, Cout), x2.dtype),
        in_specs=[pl.BlockSpec((tm, K), lambda i: (i, 0)),
                  pl.BlockSpec((K, Cout), lambda i: (0, 0)),
                  pl.BlockSpec((1, Cout), lambda i: (0, 0))],
        out_specs=pl.BlockSpec((tm, Cout), lambda i: (i, 0)),
        compiler_params=pltpu.CompilerParams(
            dimension_semantics=("parallel",),
            vmem_limit_bytes=VMEM_LIMIT),
    )(x2, w, b)


@functools.partial(jax.jit, static_argnames=("act",))
def conv1x1(x, w, b, *, act="silu"):
    N, H, W, C = x.shape
    Cout = w.shape[1]
    y2 = _matmul_flat(x.reshape(N * H * W, C), w, b, act)
    return y2.reshape(N, H, W, Cout)


# ---------------------------------------------------------------------------
# Projection 1x1 conv with fused SE gate (MLP recomputed per tile) + residual
# ---------------------------------------------------------------------------
def _proj_kernel(*refs, has_res):
    (x_ref, m_ref, w1_ref, b1_ref, w2_ref, b2_ref, w_ref, b_ref) = refs[:8]
    res_ref = refs[8] if has_res else None
    o_ref = refs[-1]

    # SE gate: tiny MLP on the depthwise spatial mean, recomputed per tile
    # (negligible vs. the main matmul; keeps both grid axes "parallel" and
    # avoids any HBM round trip for the gate).
    m = m_ref[0].astype(jnp.bfloat16)                               # (1, Cexp)
    h = jnp.dot(m, w1_ref[...], preferred_element_type=jnp.float32) + b1_ref[...]
    h = _silu(h)
    g = jnp.dot(h.astype(jnp.bfloat16), w2_ref[...],
                preferred_element_type=jnp.float32) + b2_ref[...]
    g = _sigmoid(g)                                                 # (1, Cexp)

    x = x_ref[0] * g.astype(x_ref.dtype)                            # SE-scaled LHS
    acc = jnp.dot(x, w_ref[...], preferred_element_type=jnp.float32) + b_ref[...]
    if has_res:
        acc = acc + res_ref[0].astype(jnp.float32)                  # fused residual
    o_ref[0] = acc.astype(o_ref.dtype)


@jax.jit
def project_conv(x, se_mean, w1, b1, w2, b2, w, b, residual=None):
    N, H, W, Cexp = x.shape
    Cout = w.shape[1]
    M = H * W
    tm = min(TM, M)
    grid = (N, pl.cdiv(M, tm))
    x3 = x.reshape(N, M, Cexp)
    has_res = residual is not None

    in_specs = [pl.BlockSpec((1, tm, Cexp), lambda n, i: (n, i, 0)),
                pl.BlockSpec((1, 1, Cexp), lambda n, i: (n, 0, 0)),
                _full_spec(w1.shape), _full_spec(b1.shape),
                _full_spec(w2.shape), _full_spec(b2.shape),
                _full_spec(w.shape), _full_spec(b.shape)]
    inputs = [x3, se_mean, w1, b1, w2, b2, w, b]
    if has_res:
        in_specs.append(pl.BlockSpec((1, tm, Cout), lambda n, i: (n, i, 0)))
        inputs.append(residual.reshape(N, M, Cout))

    y3 = pl.pallas_call(
        functools.partial(_proj_kernel, has_res=has_res),
        grid=grid,
        out_shape=jax.ShapeDtypeStruct((N, M, Cout), x.dtype),
        in_specs=in_specs,
        out_specs=pl.BlockSpec((1, tm, Cout), lambda n, i: (n, i, 0)),
        compiler_params=pltpu.CompilerParams(
            dimension_semantics=("parallel", "parallel"),
            vmem_limit_bytes=VMEM_LIMIT),
    )(*inputs)
    return y3.reshape(N, H, W, Cout)


# ---------------------------------------------------------------------------
# Depthwise conv: row-tiled with halo, taps sliced from refs, bf16 VPU MAC,
# fused bias+SiLU and per-tile SE partial sums.
# ---------------------------------------------------------------------------
def _dw_kernel(*refs, k, s, th, rh, Ho, Wo, use_halo):
    nph = s * s
    mains = refs[:nph]
    pos = nph
    halos = None
    if use_halo:
        halos = refs[pos:pos + nph]
        pos += nph
    w_ref, b_ref = refs[pos], refs[pos + 1]
    y_ref, m_ref = refs[pos + 2], refs[pos + 3]
    xbuf = refs[pos + 4] if use_halo else None

    acc = None
    for a in range(s):
        for c in range(s):
            p = a * s + c
            if use_halo:
                # stitch main rows + rh halo rows into one contiguous buffer
                xbuf[0:th] = mains[p][0]
                xbuf[th:th + rh] = halos[p][0]
            for kh in range(a, k, s):
                for kw in range(c, k, s):
                    r0, c0 = kh // s, kw // s
                    if use_halo:
                        tap = xbuf[r0:r0 + th, c0:c0 + Wo, :]
                    else:
                        tap = mains[p][0, r0:r0 + th, c0:c0 + Wo, :]
                    # bf16 multiply-accumulate (VPU); f32 epilogue below.
                    term = tap * w_ref[kh * k + kw]
                    acc = term if acc is None else acc + term

    accf = acc.astype(jnp.float32) + b_ref[...]
    accf = _silu(accf)
    y_ref[0] = accf.astype(y_ref.dtype)

    # per-tile spatial sum for squeeze-excitation (finished in JAX; keeps the
    # row-tile grid axis "parallel")
    if Ho % th != 0:
        t = pl.program_id(1)
        rows = lax.broadcasted_iota(jnp.int32, (th, 1, 1), 0) + t * th
        accf = jnp.where(rows < Ho, accf, 0.0)
    m_ref[0, 0] = jnp.sum(jnp.sum(accf, axis=0), axis=0, keepdims=True)


@functools.partial(jax.jit, static_argnames=("k", "stride"))
def depthwise_conv(x, w, b, *, k, stride):
    N, H, W, C = x.shape
    s = stride
    pad = (k - 1) // 2
    Ho = (H + 2 * pad - k) // s + 1
    Wo = (W + 2 * pad - k) // s + 1
    rh = (k - 1) // s                      # extra rows/cols beyond a tile (halo)
    use_halo = Ho > DW_TH
    th = DW_TH if use_halo else Ho         # DW_TH is a multiple of every rh<=4
    nrt = -(-Ho // th)
    Hpad = nrt * th + rh
    Wneed = Wo + rh
    # TODO(synk): this pad + stride-phase split is one extra XLA pass over the
    # activation; fully in-kernel border handling needs dynamic-size DMAs.
    xp = jnp.pad(x, ((0, 0),
                     (pad, s * Hpad - H - pad),
                     (pad, s * Wneed - W - pad),
                     (0, 0)))
    phases = [xp[:, a::s, c::s, :][:, :Hpad, :Wneed, :]
              for a in range(s) for c in range(s)]
    nph = s * s

    main_rows = th if use_halo else th + rh
    main_spec = pl.BlockSpec((1, main_rows, Wneed, C), lambda n, t: (n, t, 0, 0))
    in_specs = [main_spec] * nph
    inputs = list(phases)
    scratch = []
    if use_halo:
        hstep = th // rh
        halo_spec = pl.BlockSpec((1, rh, Wneed, C),
                                 lambda n, t: (n, (t + 1) * hstep, 0, 0))
        in_specs += [halo_spec] * nph
        inputs += list(phases)
        scratch.append(pltpu.VMEM((th + rh, Wneed, C), x.dtype))
    in_specs += [_full_spec(w.shape), _full_spec(b.shape)]
    inputs += [w, b]

    y, psum = pl.pallas_call(
        functools.partial(_dw_kernel, k=k, s=s, th=th, rh=rh,
                          Ho=Ho, Wo=Wo, use_halo=use_halo),
        grid=(N, nrt),
        out_shape=(jax.ShapeDtypeStruct((N, Ho, Wo, C), x.dtype),
                   jax.ShapeDtypeStruct((N, nrt, 1, C), jnp.float32)),
        in_specs=in_specs,
        out_specs=(pl.BlockSpec((1, th, Wo, C), lambda n, t: (n, t, 0, 0)),
                   pl.BlockSpec((1, 1, 1, C), lambda n, t: (n, t, 0, 0))),
        scratch_shapes=scratch,
        compiler_params=pltpu.CompilerParams(
            dimension_semantics=("parallel", "parallel"),
            vmem_limit_bytes=VMEM_LIMIT),
    )(*inputs)
    se_mean = jnp.sum(psum[:, :, 0, :], axis=1, keepdims=True) * (1.0 / (Ho * Wo))
    return y, se_mean                                   # (N,Ho,Wo,C), (N,1,C) f32


# ---------------------------------------------------------------------------
# Head 1x1 conv + SiLU fused with AdaptiveAvgPool2d(1)
# ---------------------------------------------------------------------------
def _head_gap_kernel(x_ref, w_ref, b_ref, o_ref, acc_ref, *, hw):
    i = pl.program_id(1)

    @pl.when(i == 0)
    def _():
        acc_ref[...] = jnp.zeros_like(acc_ref)

    y = jnp.dot(x_ref[0], w_ref[...],
                preferred_element_type=jnp.float32) + b_ref[...]
    y = _silu(y)
    tm = y.shape[0]
    if hw % tm != 0:
        rows = lax.broadcasted_iota(jnp.int32, (tm, 1), 0) + i * tm
        y = jnp.where(rows < hw, y, 0.0)                 # mask padded rows
    acc_ref[...] += jnp.sum(y, axis=0, keepdims=True)

    @pl.when(i == pl.num_programs(1) - 1)
    def _():
        o_ref[0] = acc_ref[...] * (1.0 / hw)


@jax.jit
def head_conv_gap(x, w, b):
    N, H, W, C = x.shape
    K, Cout = w.shape
    M = H * W
    tm = min(TM, M)
    grid = (N, pl.cdiv(M, tm))
    x3 = x.reshape(N, M, C)
    out = pl.pallas_call(
        functools.partial(_head_gap_kernel, hw=M),
        grid=grid,
        out_shape=jax.ShapeDtypeStruct((N, 1, Cout), jnp.float32),
        in_specs=[pl.BlockSpec((1, tm, K), lambda n, i: (n, i, 0)),
                  pl.BlockSpec((K, Cout), lambda n, i: (0, 0)),
                  pl.BlockSpec((1, Cout), lambda n, i: (0, 0))],
        out_specs=pl.BlockSpec((1, 1, Cout), lambda n, i: (n, 0, 0)),
        scratch_shapes=[pltpu.VMEM((1, Cout), jnp.float32)],
        compiler_params=pltpu.CompilerParams(
            dimension_semantics=("parallel", "arbitrary"),
            vmem_limit_bytes=VMEM_LIMIT),
    )(x3, w, b)
    return out.reshape(N, Cout)


# ---------------------------------------------------------------------------
# Stem 3x3 stride-2 conv (im2col in JAX feeding the flattened Pallas matmul)
# ---------------------------------------------------------------------------
def _extract_taps(x, k, stride, pad):
    N, H, W, C = x.shape
    xp = jnp.pad(x, ((0, 0), (pad, pad), (pad, pad), (0, 0)))
    Ho = (H + 2 * pad - k) // stride + 1
    Wo = (W + 2 * pad - k) // stride + 1
    taps = []
    for kh in range(k):
        for kw in range(k):
            taps.append(xp[:, kh:kh + (Ho - 1) * stride + 1:stride,
                              kw:kw + (Wo - 1) * stride + 1:stride, :])
    return taps, Ho, Wo


@jax.jit
def stem_conv(x, w, b):
    # TODO(synk): form the stem taps in-kernel like the depthwise path.
    N, H, W, C = x.shape
    k, stride, pad = 3, 2, 1
    taps, Ho, Wo = _extract_taps(x, k, stride, pad)
    patches = jnp.stack(taps, axis=3)                     # (N,Ho,Wo,k*k,C)
    patches = jnp.transpose(patches, (0, 1, 2, 4, 3))     # (N,Ho,Wo,C,k*k)
    patches = patches.reshape(N * Ho * Wo, C * k * k)
    y = _matmul_flat(patches, w, b, "silu")
    return y.reshape(N, Ho, Wo, -1)


# ---------------------------------------------------------------------------
# EfficientNet-B4 configuration (torchvision: width_mult=1.4, depth_mult=1.8)
# ---------------------------------------------------------------------------
_WIDTH_MULT = 1.4
_DEPTH_MULT = 1.8
_BN_EPS = 1e-5
_B0_BLOCKS = [
    (1, 3, 1, 32, 16, 1),
    (6, 3, 2, 16, 24, 2),
    (6, 5, 2, 24, 40, 2),
    (6, 3, 2, 40, 80, 3),
    (6, 5, 1, 80, 112, 3),
    (6, 5, 2, 112, 192, 4),
    (6, 3, 1, 192, 320, 1),
]


def _make_divisible(v, divisor=8):
    new_v = max(divisor, int(v + divisor / 2) // divisor * divisor)
    if new_v < 0.9 * v:
        new_v += divisor
    return new_v


def _adjust(c):
    return _make_divisible(c * _WIDTH_MULT)


def build_b4_config():
    cfgs = []
    for (e, k, s, ci, co, n) in _B0_BLOCKS:
        ci_a, co_a = _adjust(ci), _adjust(co)
        reps = int(math.ceil(n * _DEPTH_MULT))
        for i in range(reps):
            cfgs.append(dict(expand=e, kernel=k,
                             stride=s if i == 0 else 1,
                             cin=ci_a if i == 0 else co_a,
                             cout=co_a))
    stem_out = _adjust(32)            # 48
    head_in = _adjust(320)            # 448
    head_out = 4 * head_in            # 1792
    return stem_out, cfgs, head_in, head_out


# ---------------------------------------------------------------------------
# Deterministic parameter init (BatchNorm eval stats folded into conv w/b)
# ---------------------------------------------------------------------------
def _he(key, shape, fan_in):
    return jax.random.normal(key, shape, jnp.float32) * np.sqrt(2.0 / fan_in)


def _fold_bn(key, cout):
    k1, k2, k3, k4 = jax.random.split(key, 4)
    gamma = 1.0 + 0.1 * jax.random.normal(k1, (cout,), jnp.float32)
    beta = 0.02 * jax.random.normal(k2, (cout,), jnp.float32)
    mean = 0.02 * jax.random.normal(k3, (cout,), jnp.float32)
    var = 1.0 + 0.1 * jax.random.uniform(k4, (cout,), jnp.float32)
    scale = gamma / jnp.sqrt(var + _BN_EPS)
    shift = beta - mean * scale
    return scale, shift


def conv_bn_params(key, cin, cout, k):
    kw, kb = jax.random.split(key)
    w = _he(kw, (cin * k * k, cout), cin * k * k)
    scale, shift = _fold_bn(kb, cout)
    return (w * scale[None, :]).astype(jnp.bfloat16), shift[None, :]


def dwconv_bn_params(key, c, k):
    kw, kb = jax.random.split(key)
    w = _he(kw, (k * k, 1, c), k * k)
    scale, shift = _fold_bn(kb, c)
    return (w * scale[None, None, :]).astype(jnp.bfloat16), shift[None, :]


def se_params(key, c_exp, c_sq):
    k1, k2, k3, k4 = jax.random.split(key, 4)
    w1 = _he(k1, (c_exp, c_sq), c_exp).astype(jnp.bfloat16)
    b1 = 0.02 * jax.random.normal(k2, (1, c_sq), jnp.float32)
    w2 = _he(k3, (c_sq, c_exp), c_sq).astype(jnp.bfloat16)
    b2 = 0.02 * jax.random.normal(k4, (1, c_exp), jnp.float32)
    return w1, b1, w2, b2


def init_params(key):
    stem_out, cfgs, head_in, head_out = build_b4_config()
    keys = jax.random.split(key, len(cfgs) + 2)
    params = {"stem": conv_bn_params(keys[0], 3, stem_out, 3)}
    blocks = []
    for cfg, bkey in zip(cfgs, keys[1:-1]):
        k_e, k_d, k_s, k_p = jax.random.split(bkey, 4)
        cin, cout, e = cfg["cin"], cfg["cout"], cfg["expand"]
        cexp = _make_divisible(cin * e)
        csq = max(1, cin // 4)
        p = {}
        if cexp != cin:
            p["expand"] = conv_bn_params(k_e, cin, cexp, 1)
        p["dw"] = dwconv_bn_params(k_d, cexp, cfg["kernel"])
        p["se"] = se_params(k_s, cexp, csq)
        p["proj"] = conv_bn_params(k_p, cexp, cout, 1)
        blocks.append(p)
    params["blocks"] = blocks
    params["head"] = conv_bn_params(keys[-1], head_in, head_out, 1)
    return params, cfgs


# ---------------------------------------------------------------------------
# EfficientNetModel.forward: x -> backbone.features(x) -> AdaptiveAvgPool2d(1)
# ---------------------------------------------------------------------------
def efficientnet_model_forward(x_nchw, params, cfgs):
    x = jnp.transpose(x_nchw, (0, 2, 3, 1)).astype(jnp.bfloat16)   # NCHW -> NHWC
    # stem: Conv 3x3 s2 + BN + SiLU
    sw, sb = params["stem"]
    x = stem_conv(x, sw, sb)
    # 32 MBConv blocks (B4: depths 2,4,4,6,6,8,2)
    for cfg, p in zip(cfgs, params["blocks"]):
        shortcut = x
        if "expand" in p:
            ew, eb = p["expand"]
            x = conv1x1(x, ew, eb, act="silu")
        dw_w, dw_b = p["dw"]
        x, se_mean = depthwise_conv(x, dw_w, dw_b,
                                    k=cfg["kernel"], stride=cfg["stride"])
        w1, b1, w2, b2 = p["se"]
        pw, pb = p["proj"]
        use_res = cfg["stride"] == 1 and cfg["cin"] == cfg["cout"]
        x = project_conv(x, se_mean, w1, b1, w2, b2, pw, pb,
                         residual=shortcut if use_res else None)
    # head: Conv 1x1 448 -> 1792 + BN + SiLU, fused with AdaptiveAvgPool2d(1)
    hw_w, hw_b = params["head"]
    pooled = head_conv_gap(x, hw_w, hw_b)              # (N, 1792) f32
    N, C = pooled.shape
    return pooled.reshape(N, C, 1, 1)                  # NCHW, like PyTorch


if __name__ == "__main__":
    key = jax.random.PRNGKey(0)
    pkey, xkey = jax.random.split(key)
    params, cfgs = init_params(pkey)
    # EfficientNet-B4 normally runs at 380x380; 96x96 keeps every feature map
    # >= 3x3 through the five stride-2 reductions while staying small, and it
    # exercises the row-tiled/halo depthwise path (stage-1 maps are 48x48).
    x = jax.random.normal(xkey, (2, 3, 96, 96), jnp.float32)   # NCHW like PyTorch
    out = efficientnet_model_forward(x, params, cfgs)
    out = jax.block_until_ready(out)
    assert out.shape == (2, 1792, 1, 1), out.shape
    assert out.dtype == jnp.float32, out.dtype
    assert bool(jnp.all(jnp.isfinite(out)))
    print("KERNEL_OK")
</pallas_src>

<mosaic_0001>
module attributes {stable_mosaic.version = 11 : i64} {
  func.func @_mm_flat_kernel(%arg0: i32, %arg1: memref<512x27xbf16, #tpu.memory_space<vmem>>, %arg2: memref<27x48xbf16, #tpu.memory_space<vmem>>, %arg3: memref<1x48xf32, #tpu.memory_space<vmem>>, %arg4: memref<512x48xbf16, #tpu.memory_space<vmem>>) attributes {dimension_semantics = [#tpu.dimension_semantics<parallel>], iteration_bounds = array<i64: 9>, scalar_prefetch = 0 : i64, scratch_operands = 0 : i64, tpu.core_type = #tpu.core_type<tc>, window_params = [{transform_indices = @transform_0, window_bounds = array<i64: 512, 27>}, {pipeline_mode = #tpu.pipeline_mode<synchronous>, transform_indices = @transform_1, window_bounds = array<i64: 27, 48>}, {pipeline_mode = #tpu.pipeline_mode<synchronous>, transform_indices = @transform_2, window_bounds = array<i64: 1, 48>}, {transform_indices = @transform_3, window_bounds = array<i64: 512, 48>}]} {
    %c0 = arith.constant 0 : index
    %c0_0 = arith.constant 0 : index
    %0 = vector.load %arg1[%c0, %c0_0] : memref<512x27xbf16, #tpu.memory_space<vmem>>, vector<512x27xbf16>
    %c0_1 = arith.constant 0 : index
    %c0_2 = arith.constant 0 : index
    %1 = vector.load %arg2[%c0_1, %c0_2] : memref<27x48xbf16, #tpu.memory_space<vmem>>, vector<27x48xbf16>
    %cst = arith.constant dense<0.000000e+00> : vector<512x48xf32>
    %2 = tpu.matmul %0, %1, %cst {dimension_numbers = #tpu.dot_dimension_numbers<[1], [0], [0], [1], [0, 0, 1, 1], [], []>} : vector<512x27xbf16>, vector<27x48xbf16>, vector<512x48xf32> -> vector<512x48xf32>
    %c0_3 = arith.constant 0 : index
    %c0_4 = arith.constant 0 : index
    %3 = vector.load %arg3[%c0_3, %c0_4] : memref<1x48xf32, #tpu.memory_space<vmem>>, vector<1x48xf32>
    %4 = vector.broadcast %3 : vector<1x48xf32> to vector<512x48xf32>
    %5 = arith.addf %2, %4 : vector<512x48xf32>
    %cst_5 = arith.constant 5.000000e-01 : f32
    %6 = vector.broadcast %cst_5 : f32 to vector<512x48xf32>
    %7 = arith.mulf %6, %5 : vector<512x48xf32>
    %8 = math.tanh %7 : vector<512x48xf32>
    %cst_6 = arith.constant 5.000000e-01 : f32
    %9 = vector.broadcast %cst_6 : f32 to vector<512x48xf32>
    %10 = arith.mulf %9, %8 : vector<512x48xf32>
    %cst_7 = arith.constant 5.000000e-01 : f32
    %11 = vector.broadcast %cst_7 : f32 to vector<512x48xf32>
    %12 = arith.addf %10, %11 : vector<512x48xf32>
    %13 = arith.mulf %5, %12 : vector<512x48xf32>
    %14 = arith.truncf %13 : vector<512x48xf32> to vector<512x48xbf16>
    %c0_8 = arith.constant 0 : index
    %c0_9 = arith.constant 0 : index
    %15 = vector.load %arg4[%c0_8, %c0_9] : memref<512x48xbf16, #tpu.memory_space<vmem>>, vector<512x48xbf16>
    tpu.vector_store %arg4[%c0_8, %c0_9], %14 {strides = array<i32>} : memref<512x48xbf16, #tpu.memory_space<vmem>>, vector<512x48xbf16>,
    return
  }
  func.func @transform_0(%arg0: i32) -> (i32, i32) {
    %c0_i32 = arith.constant 0 : i32
    %c0_i32_0 = arith.constant 0 : i32
    return %arg0, %c0_i32 : i32, i32
  }
  func.func @transform_1(%arg0: i32) -> (i32, i32) {
    %c0_i32 = arith.constant 0 : i32
    %c0_i32_0 = arith.constant 0 : i32
    %c0_i32_1 = arith.constant 0 : i32
    return %c0_i32, %c0_i32_0 : i32, i32
  }
  func.func @transform_2(%arg0: i32) -> (i32, i32) {
    %c0_i32 = arith.constant 0 : i32
    %c0_i32_0 = arith.constant 0 : i32
    %c0_i32_1 = arith.constant 0 : i32
    return %c0_i32, %c0_i32_0 : i32, i32
  }
  func.func @transform_3(%arg0: i32) -> (i32, i32) {
    %c0_i32 = arith.constant 0 : i32
    %c0_i32_0 = arith.constant 0 : i32
    return %arg0, %c0_i32 : i32, i32
  }
}

</mosaic_0001>

<bundles_post_ra>
// kernel: stem_conv.1
= control target key start
LH: loop header
LB: loop body
LE: loop exit
PB: predicated region body
PF: predicated region fallthrough
CT: control target
= control target key end

     0   :  { %8 = vsyncpa [#allocation3], 0  ;;  %s2883_s0 = inlined_call_operand.vmem [shape: bf16[4608,27], index: 0, kind: input, shape index: {}]   ;;  %s2884_s1 = inlined_call_operand.vmem [shape: bf16[27,48], index: 1, kind: input, shape index: {}]   ;;  %s2885_s2 = inlined_call_operand.vmem [shape: f32[1,48], index: 2, kind: input, shape index: {}]   ;;  %s2886_s3 = inlined_call_operand.hbm [shape: bf16[4608,48], index: 3, kind: output, shape index: {}]  }
   0x1   :  { %10 = vsyncpa [#allocation3 + $0x1], 0  ;;  %s2136_s12 = smov 0   ;;  %s2138_s13 = smov 0  }
   0x2   :  { %s2140_s14 = smov 0   ;;  %s2142_s15 = smov 0  }
   0x3 LB: > { %s2157_s16 = sadd.s32 4294967295, %s2110_s15   ;;  %s1529_s17 = sadd.s32 4294967294, %s2110_s15   ;;  %s2110_s15 = sphi %s2142_s15, %s2892_s15   ;;  %s2106_s14 = sphi %s2140_s14, %s2891_s14   ;;  %s2102_s13 = sphi %s2138_s13, %s2890_s13   ;;  %s2098_s12 = sphi %s2136_s12, %s2889_s12  }
   0x4   : > { %s2161_s18 = sadd.s32 1, %s2110_s15   ;;  %s91_s19 = sadd.s32 1, %s2106_s14 }
   0x5   : > { %s88_s20 = ssub.s32 %s2110_s15, %s2161_s18  ;;  %p101_p0 = scmp.ne.s32.totalorder %s2106_s14, %s2102_s13 }
   0x6   : > { %p89_p1 = scmp.eq.s32.totalorder %s88_s20, 0  ;;  %p102_p2 = scmp.eq.s32.totalorder %s2157_s16, 8 }
   0x7   : > { %p107_p3 = scmp.ne.s32.totalorder %s2102_s13, %s2098_s12  ;;  %p108_p4 = scmp.eq.s32.totalorder %s1529_s17, 8 }
   0x8   : > { %s2172_s21 = scalar_select %p89_p1, %s2106_s14, %s91_s19  }
   0x9   : > { %p2174_p5 = por %p102_p2, %p101_p0  ;;  %p2178_p6 = por %p108_p4, %p107_p3 }
   0xa   : > { %p1532_p7 = scmp.ge.s32.totalorder %s2110_s15, 1  ;;  %p141_p8 = scmp.lt.s32.totalorder %s2110_s15, 10 }
   0xc   : > { %p142_p9 = pnand %p1532_p7, %p141_p8 }
   0xd   : > { %v1885_v0 = vld [vmem:[%s2884_s1] sm:$0xff] (!%p142_p9)   ;;  %vm516_vm0 = vcmask (!%p142_p9), 1044480   ;;  %v1886_v1 = vld [vmem:[%s2884_s1 + $0x8] sm:$0x3f] (!%p142_p9)   ;;  %vm517_vm1 = vcmask (!%p142_p9), 1045504   ;;  %s1534_s28 = sshll.u32 (!%p142_p9), %s2157_s16, 6 }
   0xe   : > { %145 = sbr.rel (%p142_p9) target bundleno = 384 (0x180), region = 32  ;;  %1771 = vmatprep.subr.bf16.mxu0 (!%p142_p9), %v1885_v0  ;;  %1839 = vmatprep.subr.bf16.mxu1 (!%p142_p9), %v1885_v0  ;;  %v2112_v2 = vmov (!%p142_p9), 65535   ;;  %p166_p10 = scmp.lt.s32.totalorder (!%p142_p9), %s1534_s28, 575  ;;  %vm419_vm2 = vcmask (!%p142_p9), 220160   ;;  %v2263_v38 = vld [vmem:[%s2885_s2] ss:$0 sm:$0xff] (!%p142_p9) }
   0xf   : > { %1772 = vmatpush3.bf16.msra.mxu0 (!%p142_p9), %v1885_v0  ;;  %1841 = vmatpush3.bf16.msra.mxu1 (!%p142_p9), %v1885_v0  ;;  %v518_v3 = vsel (!%p142_p9), %vm516_vm0, 4294967295, %v2112_v2  ;;  %s162_s8 = sand.u32 (!%p142_p9), 1, %s2102_s13   ;;  %vm1388_vm3 = vcmask (!%p142_p9), 388096   ;;  %s1736_s19 = sshll.u32 (!%p142_p9), %s2157_s16, 12 }
  0x10   : > { %v519_v4 = vsel (!%p142_p9), %vm517_vm1, %v518_v3, 0  ;;  %s2337_s9 = sshll.u32 (!%p142_p9), %s162_s8, 8  ;;  %s2830_s26 = scalar_lea.hbm (!%p142_p9), %s2886_s3, %s1736_s19 }
  0x11   : > { %v521_v5 = vand.u32 (!%p142_p9), %v1886_v1, %v519_v4  ;;  %s2358_s10 = scalar_lea.vmem (!%p142_p9), [#allocation2], %s2337_s9  ;;  %s2842_s16 = scalar_lea.sflag (!%p142_p9), [#allocation3], %s162_s8 }
  0x12   : > { %s1467_s20 = sshll.u32 (!%p142_p9), %s2358_s10, 4  ;;  %s2832_s20 = int_to_ptr.vmem [resolvable:$true] %s1467_s20 }
  0x13   : > { %1773 = vmatprep.subr.bf16.mxu0 (!%p142_p9), %v521_v5  ;;  %1840 = vmatprep.subr.bf16.mxu1 (!%p142_p9), %v521_v5  ;;  %s2048_s27 = scalar_lea.vmem (!%p142_p9), %s2832_s20, 4096 }
  0x14   : > { %1774 = vmatpush3.bf16.msra.mxu0 (!%p142_p9), %v521_v5  ;;  %1842 = vmatpush3.bf16.msra.mxu1 (!%p142_p9), %v521_v5  ;;  %p2049_p11 = scmp.ne.s32.totalorder (!%p142_p9), %s2832_s20, %s2048_s27 }
  0x15   : > { %s2894_s28 = smov (!%p166_p10, %s1534_s28), 575 }
  0x16   : > { %s1535_s29 = sshll.u32 %s2894_s28, 2  ;;  %p2050_p12 = pnand %p2049_p11, %p2174_p5 }
  0x17   : > { %s2194_s5 = scalar_lea.vmem %s2883_s0, %s1535_s29  ;;  %s2113_s28 = smov [#allocation2]  }
  0x18   : > { %v1887_v6 = vld [vmem:[%s2194_s5] sm:$0xff]   ;;  %v1889_v8 = vld [vmem:[%s2194_s5 + $0x8] sm:$0xff]   ;;  %v1891_v10 = vld [vmem:[%s2194_s5 + $0x10] sm:$0xff]   ;;  %p2051_p13 = pneg %p2050_p12  ;;  %s2052_s29 = sshll.u32 %s2113_s28, 4  ;;  %s2053_s29 = int_to_ptr.vmem [resolvable:$false] %s2052_s29 }
  0x19   : > { %v1888_v7 = vld [vmem:[%s2194_s5 + $0x80] sm:$0xff]   ;;  %1775 = vmatprep.mubr.msk.bf16.mxu0 %vm419_vm2, %v1887_v6  ;;  %v1890_v9 = vld [vmem:[%s2194_s5 + $0x88] sm:$0xff]   ;;  %v1892_v11 = vld [vmem:[%s2194_s5 + $0x90] sm:$0xff]   ;;  %s2054_s30 = scalar_lea.vmem %s2053_s29, 8192  ;;  %p2055_p0 = scmp.lt.s32.totalorder %s2832_s20, %s2053_s29 }
  0x1a   : > { %1807 = vmatprep.mubr.msk.bf16.mxu1 %vm419_vm2, %v1888_v7  ;;  %1776 = vmatmul.mubr.msk.bf16.vlgmr.msra.gmra.mrb[0].mxu0 %vm419_vm2, %v1889_v8  ;;  %v1893_v12 = vld [vmem:[%s2194_s5 + $0x18] sm:$0xff]   ;;  %v1895_v14 = vld [vmem:[%s2194_s5 + $0x20] sm:$0xff]   ;;  %v1897_v16 = vld [vmem:[%s2194_s5 + $0x28] sm:$0xff]   ;;  %p2056_p1 = scmp.lt.s32.totalorder %s2054_s30, %s2048_s27 }
  0x1b   : > { %1808 = vmatmul.mubr.msk.bf16.vlgmr.msra.gmra.mrb[0].mxu1 %vm419_vm2, %v1890_v9  ;;  %1779 = vmatprep.mubr.msk.bf16.mxu0 %vm419_vm2, %v1891_v10  ;;  %v1894_v13 = vld [vmem:[%s2194_s5 + $0x98] sm:$0xff]   ;;  %v1896_v15 = vld [vmem:[%s2194_s5 + $0xa0] sm:$0xff]   ;;  %v1898_v17 = vld [vmem:[%s2194_s5 + $0xa8] sm:$0xff]  }
  0x1c   : > { %1811 = vmatprep.mubr.msk.bf16.mxu1 %vm419_vm2, %v1892_v11  ;;  %v1899_v18 = vld [vmem:[%s2194_s5 + $0x30] sm:$0xff]   ;;  %v1901_v20 = vld [vmem:[%s2194_s5 + $0x38] sm:$0xff]   ;;  %v1903_v22 = vld [vmem:[%s2194_s5 + $0x40] sm:$0xff]   ;;  %p2057_p2 = por %p2056_p1, %p2055_p0 }
  0x1d   : > { %v1900_v19 = vld [vmem:[%s2194_s5 + $0xb0] sm:$0xff]   ;;  %v1902_v21 = vld [vmem:[%s2194_s5 + $0xb8] sm:$0xff]   ;;  %v1904_v23 = vld [vmem:[%s2194_s5 + $0xc0] sm:$0xff]  }
  0x1e   : > { %v1905_v24 = vld [vmem:[%s2194_s5 + $0x48] sm:$0xff]   ;;  %v1907_v26 = vld [vmem:[%s2194_s5 + $0x50] sm:$0xff]   ;;  %v1909_v28 = vld [vmem:[%s2194_s5 + $0x58] sm:$0xff]   ;;  %p2058_p3 = pnand %p2057_p2, %p2051_p13 }
  0x1f   : > { %v1906_v25 = vld [vmem:[%s2194_s5 + $0xc8] sm:$0xff]   ;;  %v1908_v27 = vld [vmem:[%s2194_s5 + $0xd0] sm:$0xff]   ;;  %v1910_v29 = vld [vmem:[%s2194_s5 + $0xd8] sm:$0xff]  }
  0x20   : > { %v1911_v30 = vld [vmem:[%s2194_s5 + $0x60] sm:$0xff]   ;;  %v1913_v32 = vld [vmem:[%s2194_s5 + $0x68] sm:$0xff]   ;;  %v1915_v34 = vld [vmem:[%s2194_s5 + $0x70] sm:$0xff]  }
  0x21   : > { %v1912_v31 = vld [vmem:[%s2194_s5 + $0xe0] sm:$0xff]   ;;  %v1914_v33 = vld [vmem:[%s2194_s5 + $0xe8] sm:$0xff]   ;;  %v1916_v35 = vld [vmem:[%s2194_s5 + $0xf0] sm:$0xff]  }
  0x22   : > { %1780 = vmatmul.mubr.msk.bf16.gmra.mrb[4].mxu0 %vm419_vm2, %v1893_v12  ;;  %v1917_v36 = vld [vmem:[%s2194_s5 + $0x78] sm:$0xff]  }
  0x23   : > { %1812 = vmatmul.mubr.msk.bf16.gmra.mrb[4].mxu1 %vm419_vm2, %v1894_v13  ;;  %1783 = vmatprep.mubr.msk.bf16.mxu0 %vm419_vm2, %v1895_v14  ;;  %v1918_v37 = vld [vmem:[%s2194_s5 + $0xf8] sm:$0xff]  }
  0x24   : > { %1815 = vmatprep.mubr.msk.bf16.mxu1 %vm419_vm2, %v1896_v15 }
  0x2a   : > { %1784 = vmatmul.mubr.msk.bf16.gmra.mrb[8].mxu0 %vm419_vm2, %v1897_v16 }
  0x2b   : > { %1816 = vmatmul.mubr.msk.bf16.gmra.mrb[8].mxu1 %vm419_vm2, %v1898_v17  ;;  %1787 = vmatprep.mubr.msk.bf16.mxu0 %vm419_vm2, %v1899_v18 }
  0x2c   : > { %1819 = vmatprep.mubr.msk.bf16.mxu1 %vm419_vm2, %v1900_v19 }
  0x32   : > { %1788 = vmatmul.mubr.msk.bf16.gmra.mrb[12].mxu0 %vm419_vm2, %v1901_v20 }
  0x33   : > { %1820 = vmatmul.mubr.msk.bf16.gmra.mrb[12].mxu1 %vm419_vm2, %v1902_v21  ;;  %1791 = vmatprep.mubr.msk.bf16.mxu0 %vm419_vm2, %v1903_v22 }
  0x34   : > { %1823 = vmatprep.mubr.msk.bf16.mxu1 %vm419_vm2, %v1904_v23 }
  0x3a   : > { %1792 = vmatmul.mubr.msk.bf16.gmra.mrb[16].mxu0 %vm419_vm2, %v1905_v24 }
  0x3b   : > { %1824 = vmatmul.mubr.msk.bf16.gmra.mrb[16].mxu1 %vm419_vm2, %v1906_v25  ;;  %1795 = vmatprep.mubr.msk.bf16.mxu0 %vm419_vm2, %v1907_v26 }
  0x3c   : > { %1827 = vmatprep.mubr.msk.bf16.mxu1 %vm419_vm2, %v1908_v27 }
  0x42   : > { %1796 = vmatmul.mubr.msk.bf16.gmra.mrb[20].mxu0 %vm419_vm2, %v1909_v28 }
  0x43   : > { %1828 = vmatmul.mubr.msk.bf16.gmra.mrb[20].mxu1 %vm419_vm2, %v1910_v29  ;;  %1799 = vmatprep.mubr.msk.bf16.mxu0 %vm419_vm2, %v1911_v30 }
  0x44   : > { %1831 = vmatprep.mubr.msk.bf16.mxu1 %vm419_vm2, %v1912_v31 }
  0x4a   : > { %1800 = vmatmul.mubr.msk.bf16.gmra.mrb[24].mxu0 %vm419_vm2, %v1913_v32 }
  0x4b   : > { %1832 = vmatmul.mubr.msk.bf16.gmra.mrb[24].mxu1 %vm419_vm2, %v1914_v33  ;;  %1803 = vmatprep.mubr.msk.bf16.mxu0 %vm419_vm2, %v1915_v34 }
  0x4c   : > { %1835 = vmatprep.mubr.msk.bf16.mxu1 %vm419_vm2, %v1916_v35 }
  0x52   : > { %1804 = vmatmul.mubr.msk.bf16.gmra.mrb[28].mxu0 %vm419_vm2, %v1917_v36 }
  0x53   : > { %1836 = vmatmul.mubr.msk.bf16.gmra.mrb[28].mxu1 %vm419_vm2, %v1918_v37 }
  0xed   : > { %v1777_v39 = vpop.f32.mrb[0].mxu0 }
  0xee   : > { %v2266_v40 = vadd.f32 %v1777_v39, %v2263_v38  ;;  %v1809_v41 = vpop.f32.mrb[0].mxu1  ;;  %v557_v42 = vpop.f32.mrb[1].mxu0 }
  0xef   : > { %v2269_v43 = vadd.f32 %v1809_v41, %v2263_v38  ;;  %v2272_v44 = vadd.f32 %v2263_v38, %v557_v42  ;;  %v685_v45 = vpop.f32.mrb[1].mxu1  ;;  %v1778_v46 = vpop.f32.mrb[2].mxu0 }
  0xf0   : > { %v814_v47 = vmul.f32 0.5, %v2266_v40  ;;  %v2276_v48 = vadd.f32 %v2263_v38, %v685_v45  ;;  %v2279_v49 = vadd.f32 %v1778_v46, %v2263_v38  ;;  %v1810_v50 = vpop.f32.mrb[2].mxu1  ;;  %v560_v51 = vpop.f32.mrb[3].mxu0 }
  0xf1   : > { %v846_v52 = vmul.f32 0.5, %v2269_v43  ;;  %v812_v53 = vmul.f32 0.5, %v2272_v44  ;;  %v2284_v54 = vadd.f32 %v1810_v50, %v2263_v38  ;;  %v2287_v55 = vadd.f32 %v2263_v38, %v560_v51  ;;  %v688_v56 = vpop.f32.mrb[3].mxu1 }
  0xf2   : > { %1919 = vtanh.f32 %v814_v47  ;;  %v844_v57 = vmul.f32 0.5, %v2276_v48  ;;  %v815_v58 = vmul.f32 0.5, %v2279_v49  ;;  %v2292_v59 = vadd.f32 %v2263_v38, %v688_v56 }
  0xf3   : > { %1921 = vtanh.f32 %v846_v52  ;;  %v847_v60 = vmul.f32 0.5, %v2284_v54  ;;  %v813_v61 = vmul.f32 0.5, %v2287_v55 }
  0xf4   : > { %1923 = vtanh.f32 %v812_v53  ;;  %v845_v62 = vmul.f32 0.5, %v2292_v59 }
  0xf5   : > { %1925 = vtanh.f32 %v844_v57  ;;  %v1781_v63 = vpop.f32.mrb[4].mxu0 }
  0xf6   : > { %1927 = vtanh.f32 %v815_v58  ;;  %v2298_v0 = vadd.f32 %v1781_v63, %v2263_v38  ;;  %v1813_v1 = vpop.f32.mrb[4].mxu1  ;;  %v573_v2 = vpop.f32.mrb[5].mxu0 }
  0xf7   : > { %1929 = vtanh.f32 %v847_v60  ;;  %v2301_v3 = vadd.f32 %v1813_v1, %v2263_v38  ;;  %v2304_v4 = vadd.f32 %v2263_v38, %v573_v2  ;;  %v701_v5 = vpop.f32.mrb[5].mxu1  ;;  %v1782_v6 = vpop.f32.mrb[6].mxu0 }
  0xf8   : > { %1931 = vtanh.f32 %v813_v61  ;;  %v818_v7 = vmul.f32 0.5, %v2298_v0  ;;  %v2308_v8 = vadd.f32 %v2263_v38, %v701_v5  ;;  %v2311_v9 = vadd.f32 %v1782_v6, %v2263_v38  ;;  %v1814_v10 = vpop.f32.mrb[6].mxu1  ;;  %v576_v11 = vpop.f32.mrb[7].mxu0 }
  0xf9   : > { %1933 = vtanh.f32 %v845_v62  ;;  %v850_v12 = vmul.f32 0.5, %v2301_v3  ;;  %v816_v13 = vmul.f32 0.5, %v2304_v4  ;;  %v2316_v14 = vadd.f32 %v1814_v10, %v2263_v38  ;;  %v704_v15 = vpop.f32.mrb[7].mxu1 }
  0xfa   : > { %1935 = vtanh.f32 %v818_v7  ;;  %v848_v16 = vmul.f32 0.5, %v2308_v8  ;;  %v819_v17 = vmul.f32 0.5, %v2311_v9  ;;  %v2321_v18 = vadd.f32 %v2263_v38, %v576_v11 }
  0xfb   : > { %1937 = vtanh.f32 %v850_v12  ;;  %v851_v19 = vmul.f32 0.5, %v2316_v14  ;;  %v2325_v20 = vadd.f32 %v2263_v38, %v704_v15 }
  0xfc   : > { %v1920_v21 = vpop.eup %1919  ;;  %1939 = vtanh.f32 %v816_v13  ;;  %v817_v22 = vmul.f32 0.5, %v2321_v18 }
  0xfd   : > { %v1922_v23 = vpop.eup %1921  ;;  %v942_v24 = vmul.f32 0.5, %v1920_v21  ;;  %1941 = vtanh.f32 %v848_v16  ;;  %v849_v25 = vmul.f32 0.5, %v2325_v20  ;;  %v1785_v26 = vpop.f32.mrb[8].mxu0 }
  0xfe   : > { %v1924_v27 = vpop.eup %1923  ;;  %v974_v28 = vmul.f32 0.5, %v1922_v23  ;;  %1943 = vtanh.f32 %v819_v17  ;;  %v2331_v29 = vadd.f32 %v1785_v26, %v2263_v38  ;;  %v1817_v30 = vpop.f32.mrb[8].mxu1 }
  0xff   : > { %v2333_v31 = vpop.f32.mrb[9].mxu0  ;;  %v1926_v32 = vpop.eup %1925  ;;  %v1006_v33 = vadd.f32 0.5, %v942_v24  ;;  %v940_v34 = vmul.f32 0.5, %v1924_v27  ;;  %1945 = vtanh.f32 %v851_v19  ;;  %v2340_v35 = vadd.f32 %v1817_v30, %v2263_v38 }
 0x100   : > { %v2342_v36 = vpop.f32.mrb[9].mxu1  ;;  %v2344_v37 = vpop.f32.mrb[10].mxu0  ;;  %v1038_v41 = vadd.f32 0.5, %v974_v28  ;;  %v972_v42 = vmul.f32 0.5, %v1926_v32  ;;  %1947 = vtanh.f32 %v817_v22  ;;  %v822_v45 = vmul.f32 0.5, %v2331_v29 }
 0x101   : > { %v1928_v39 = vpop.eup %1927  ;;  %v2347_v46 = vpop.f32.mrb[10].mxu1  ;;  %v1070_v51 = vmul.f32 %v1006_v33, %v2266_v40  ;;  %v1004_v52 = vadd.f32 0.5, %v940_v34  ;;  %1949 = vtanh.f32 %v849_v25 }
 0x102   : > { %v2349_v47 = vpop.f32.mrb[11].mxu0  ;;  %v1930_v50 = vpop.eup %1929  ;;  %v943_v53 = vmul.f32 0.5, %v1928_v39  ;;  %v1102_v58 = vmul.f32 %v1038_v41, %v2269_v43  ;;  %v1036_v60 = vadd.f32 0.5, %v972_v42  ;;  %1951 = vtanh.f32 %v822_v45 }
 0x103   : > { %v2352_v56 = vpop.f32.mrb[11].mxu1  ;;  %v1932_v57 = vpop.eup %1931  ;;  %v975_v61 = vmul.f32 0.5, %v1930_v50  ;;  %v1674_v63 = vpack.c.bf16 %v1070_v51, %v1070_v51  ;;  %v1068_v1 = vmul.f32 %v1004_v52, %v2272_v44 }
 0x104   : > { %v1934_v62 = vpop.eup %1933  ;;  %v1007_v2 = vadd.f32 0.5, %v943_v53  ;;  %v941_v5 = vmul.f32 0.5, %v1932_v57  ;;  %v1706_v40 = vpack.c.bf16 %v1102_v58, %v1102_v58  ;;  %v1100_v7 = vmul.f32 %v1036_v60, %v2276_v48 }
 0x105   : > { %v1936_v6 = vpop.eup %1935  ;;  %v1039_v10 = vadd.f32 0.5, %v975_v61  ;;  %v973_v11 = vmul.f32 0.5, %v1934_v62  ;;  %1391 = vst.msk [vmem:[%s2358_s10 + $0x8] sm:$0xf] %vm1388_vm3, %v1674_v63  ;;  %v1672_v43 = vpack.c.bf16 %v1068_v1, %v1068_v1  ;;  %v2363_v16 = vpop.f32.mrb[12].mxu0 }
 0x106   : > { %v1938_v12 = vpop.eup %1937  ;;  %v1071_v13 = vmul.f32 %v1007_v2, %v2279_v49  ;;  %v1005_v44 = vadd.f32 0.5, %v941_v5  ;;  %v946_v15 = vmul.f32 0.5, %v1936_v6  ;;  %1423 = vst.msk [vmem:[%s2358_s10 + $0x88] sm:$0xf] %vm1388_vm3, %v1706_v40  ;;  %v1704_v48 = vpack.c.bf16 %v1100_v7, %v1100_v7  ;;  %v2368_v23 = vpop.f32.mrb[12].mxu1 }
 0x107   : > { %v1940_v17 = vpop.eup %1939  ;;  %v1103_v19 = vmul.f32 %v1039_v10, %v2284_v54  ;;  %v1037_v21 = vadd.f32 0.5, %v973_v11  ;;  %v978_v22 = vmul.f32 0.5, %v1938_v12  ;;  %v2370_v24 = vpop.f32.mrb[13].mxu0  ;;  %1389 = vst.msk [vmem:[%s2358_s10] sm:$0xf] %vm1388_vm3, %v1672_v43 }
 0x108   : > { %v1942_v25 = vpop.eup %1941  ;;  %v1675_v49 = vpack.c.bf16 %v1071_v13, %v1071_v13  ;;  %v1069_v26 = vmul.f32 %v1005_v44, %v2287_v55  ;;  %v1010_v27 = vadd.f32 0.5, %v946_v15  ;;  %v944_v28 = vmul.f32 0.5, %v1940_v17  ;;  %v2375_v30 = vpop.f32.mrb[13].mxu1  ;;  %1421 = vst.msk [vmem:[%s2358_s10 + $0x80] sm:$0xf] %vm1388_vm3, %v1704_v48 }
 0x109   : > { %v2377_v32 = vpop.f32.mrb[14].mxu0  ;;  %v1944_v54 = vpop.eup %1943  ;;  %v1707_v33 = vpack.c.bf16 %v1103_v19, %v1103_v19  ;;  %v1101_v34 = vmul.f32 %v1037_v21, %v2292_v59  ;;  %v1042_v39 = vadd.f32 0.5, %v978_v22  ;;  %v976_v41 = vmul.f32 0.5, %v1942_v25 }
 0x10a   : > { %v2382_v42 = vpop.f32.mrb[14].mxu1  ;;  %v2384_v45 = vpop.f32.mrb[15].mxu0  ;;  %1392 = vst.msk [vmem:[%s2358_s10 + $0xc] sm:$0xf] %vm1388_vm3, %v1675_v49  ;;  %v1673_v50 = vpack.c.bf16 %v1069_v26, %v1069_v26  ;;  %v1074_v51 = vmul.f32 %v1010_v27, %v2298_v0  ;;  %v1008_v52 = vadd.f32 0.5, %v944_v28  ;;  %v947_v53 = vmul.f32 0.5, %v1944_v54 }
 0x10b   : > { %v1946_v55 = vpop.eup %1945  ;;  %v2389_v57 = vpop.f32.mrb[15].mxu1  ;;  %1424 = vst.msk [vmem:[%s2358_s10 + $0x8c] sm:$0xf] %vm1388_vm3, %v1707_v33  ;;  %v1705_v59 = vpack.c.bf16 %v1101_v34, %v1101_v34  ;;  %v1106_v60 = vmul.f32 %v1042_v39, %v2301_v3  ;;  %v1040_v61 = vadd.f32 0.5, %v976_v41  ;;  %v2418_v25 = vadd.f32 %v2263_v38, %v2333_v31 }
 0x10c   : > { %v1948_v58 = vpop.eup %1947  ;;  %v979_v62 = vmul.f32 0.5, %v1946_v55  ;;  %1390 = vst.msk [vmem:[%s2358_s10 + $0x4] sm:$0xf] %vm1388_vm3, %v1673_v50  ;;  %v1678_v1 = vpack.c.bf16 %v1074_v51, %v1074_v51  ;;  %v1072_v0 = vmul.f32 %v1008_v52, %v2304_v4  ;;  %v1011_v2 = vadd.f32 0.5, %v947_v53 }
 0x10d   : > { %v1950_v63 = vpop.eup %1949  ;;  %v945_v5 = vmul.f32 0.5, %v1948_v58  ;;  %1422 = vst.msk [vmem:[%s2358_s10 + $0x84] sm:$0xf] %vm1388_vm3, %v1705_v59  ;;  %v1710_v40 = vpack.c.bf16 %v1106_v60, %v1106_v60  ;;  %v1104_v7 = vmul.f32 %v1040_v61, %v2308_v8  ;;  %v2403_v4 = vpop.f32.mrb[16].mxu0  ;;  %v854_v8 = vmul.f32 0.5, %v2340_v35 }
 0x10e   : > { %v1952_v6 = vpop.eup %1951  ;;  %v1043_v10 = vadd.f32 0.5, %v979_v62  ;;  %v977_v3 = vmul.f32 0.5, %v1950_v63  ;;  %1395 = vst.msk [vmem:[%s2358_s10 + $0x18] sm:$0xf] %vm1388_vm3, %v1678_v1  ;;  %v1676_v11 = vpack.c.bf16 %v1072_v0, %v1072_v0  ;;  %v1075_v12 = vmul.f32 %v1011_v2, %v2311_v9  ;;  %v2409_v48 = vpop.f32.mrb[16].mxu1 }
 0x10f   : > { %v1009_v43 = vadd.f32 0.5, %v945_v5  ;;  %v950_v13 = vmul.f32 0.5, %v1952_v6  ;;  %1427 = vst.msk [vmem:[%s2358_s10 + $0x98] sm:$0xf] %vm1388_vm3, %v1710_v40  ;;  %v1708_v44 = vpack.c.bf16 %v1104_v7, %v1104_v7  ;;  %v2411_v19 = vpop.f32.mrb[17].mxu0  ;;  %1953 = vtanh.f32 %v854_v8 }
 0x110   : > { %v1107_v15 = vmul.f32 %v1043_v10, %v2316_v14  ;;  %v1041_v17 = vadd.f32 0.5, %v977_v3  ;;  %1393 = vst.msk [vmem:[%s2358_s10 + $0x10] sm:$0xf] %vm1388_vm3, %v1676_v11  ;;  %v1679_v9 = vpack.c.bf16 %v1075_v12, %v1075_v12  ;;  %v2420_v14 = vpop.f32.mrb[17].mxu1  ;;  %v2422_v49 = vpop.f32.mrb[18].mxu0  ;;  %v820_v34 = vmul.f32 0.5, %v2418_v25 }
 0x111   : > { %v1073_v21 = vmul.f32 %v1009_v43, %v2321_v18  ;;  %v1014_v22 = vadd.f32 0.5, %v950_v13  ;;  %1425 = vst.msk [vmem:[%s2358_s10 + $0x90] sm:$0xf] %vm1388_vm3, %v1708_v44  ;;  %v2429_v18 = vadd.f32 %v2263_v38, %v2342_v36  ;;  %v2431_v28 = vpop.f32.mrb[18].mxu1  ;;  %v2433_v31 = vpop.f32.mrb[19].mxu0  ;;  %v2450_v55 = vadd.f32 %v2347_v46, %v2263_v38 }
 0x112   : > { %v1711_v26 = vpack.c.bf16 %v1107_v15, %v1107_v15  ;;  %v1105_v27 = vmul.f32 %v1041_v17, %v2325_v20  ;;  %1396 = vst.msk [vmem:[%s2358_s10 + $0x1c] sm:$0xf] %vm1388_vm3, %v1679_v9  ;;  %v2441_v20 = vadd.f32 %v2344_v37, %v2263_v38  ;;  %v2443_v39 = vpop.f32.mrb[19].mxu1  ;;  %1955 = vtanh.f32 %v820_v34 }
 0x113   : > { %v1677_v54 = vpack.c.bf16 %v1073_v21, %v1073_v21  ;;  %v1078_v33 = vmul.f32 %v1014_v22, %v2331_v29  ;;  %v852_v41 = vmul.f32 0.5, %v2429_v18  ;;  %v2454_v29 = vadd.f32 %v2263_v38, %v2349_v47 }
 0x114   : > { %1428 = vst.msk [vmem:[%s2358_s10 + $0x9c] sm:$0xf] %vm1388_vm3, %v1711_v26  ;;  %v1709_v36 = vpack.c.bf16 %v1105_v27, %v1105_v27  ;;  %v823_v50 = vmul.f32 0.5, %v2441_v20  ;;  %v2461_v51 = vadd.f32 %v2263_v38, %v2352_v56  ;;  %v855_v46 = vmul.f32 0.5, %v2450_v55 }
 0x115   : > { %1394 = vst.msk [vmem:[%s2358_s10 + $0x14] sm:$0xf] %vm1388_vm3, %v1677_v54  ;;  %v1682_v37 = vpack.c.bf16 %v1078_v33, %v1078_v33  ;;  %1957 = vtanh.f32 %v852_v41  ;;  %v821_v52 = vmul.f32 0.5, %v2454_v29  ;;  %v2469_v47 = vadd.f32 %v2363_v16, %v2263_v38  ;;  %v2482_v59 = vpop.f32.mrb[20].mxu0 }
 0x116   : > { %1426 = vst.msk [vmem:[%s2358_s10 + $0x94] sm:$0xf] %vm1388_vm3, %v1709_v36  ;;  %1959 = vtanh.f32 %v823_v50  ;;  %v853_v53 = vmul.f32 0.5, %v2461_v51  ;;  %v2476_v56 = vadd.f32 %v2368_v23, %v2263_v38  ;;  %v2480_v58 = vadd.f32 %v2263_v38, %v2370_v24  ;;  %v2493_v62 = vpop.f32.mrb[20].mxu1  ;;  %v2495_v23 = vpop.f32.mrb[21].mxu0 }
 0x117   : > { %1399 = vst.msk [vmem:[%s2358_s10 + $0x28] sm:$0xf] %vm1388_vm3, %v1682_v37  ;;  %1961 = vtanh.f32 %v855_v46  ;;  %v826_v60 = vmul.f32 0.5, %v2469_v47  ;;  %v2487_v16 = vadd.f32 %v2263_v38, %v2375_v30  ;;  %v2491_v61 = vadd.f32 %v2377_v32, %v2263_v38  ;;  %v2503_v0 = vpop.f32.mrb[21].mxu1  ;;  %v2505_v30 = vpop.f32.mrb[22].mxu0 }
 0x118   : > { %1963 = vtanh.f32 %v821_v52  ;;  %v858_v24 = vmul.f32 0.5, %v2476_v56  ;;  %v824_v63 = vmul.f32 0.5, %v2480_v58  ;;  %v2501_v1 = vadd.f32 %v2382_v42, %v2263_v38  ;;  %v2513_v6 = vpop.f32.mrb[22].mxu1  ;;  %v2515_v40 = vpop.f32.mrb[23].mxu0 }
 0x119   : > { %1965 = vtanh.f32 %v853_v53  ;;  %v856_v32 = vmul.f32 0.5, %v2487_v16  ;;  %v827_v2 = vmul.f32 0.5, %v2491_v61  ;;  %v2511_v5 = vadd.f32 %v2263_v38, %v2384_v45  ;;  %v2526_v3 = vpop.f32.mrb[23].mxu1  ;;  %v1954_v11 = vpop.eup %1953 }
 0x11a   : > { %1967 = vtanh.f32 %v826_v60  ;;  %v859_v42 = vmul.f32 0.5, %v2501_v1  ;;  %v2520_v7 = vadd.f32 %v2263_v38, %v2389_v57  ;;  %v2524_v10 = vadd.f32 %v2403_v4, %v2263_v38 }
 0x11b   : > { %1969 = vtanh.f32 %v858_v24  ;;  %v825_v45 = vmul.f32 0.5, %v2511_v5  ;;  %v2531_v12 = vadd.f32 %v2409_v48, %v2263_v38  ;;  %v2535_v43 = vadd.f32 %v2263_v38, %v2411_v19 }
 0x11c   : > { %v982_v57 = vmul.f32 0.5, %v1954_v11  ;;  %1971 = vtanh.f32 %v824_v63  ;;  %v857_v13 = vmul.f32 0.5, %v2520_v7  ;;  %v830_v4 = vmul.f32 0.5, %v2524_v10  ;;  %v1956_v8 = vpop.eup %1955 }
 0x11d   : > { %1973 = vtanh.f32 %v856_v32  ;;  %v862_v44 = vmul.f32 0.5, %v2531_v12  ;;  %v828_v15 = vmul.f32 0.5, %v2535_v43  ;;  %v2543_v17 = vadd.f32 %v2263_v38, %v2420_v14  ;;  %v2553_v21 = vpop.f32.mrb[24].mxu0 }
 0x11e   : > { %v1046_v48 = vadd.f32 0.5, %v982_v57  ;;  %1975 = vtanh.f32 %v827_v2  ;;  %v2547_v19 = vadd.f32 %v2422_v49, %v2263_v38  ;;  %v2551_v9 = vadd.f32 %v2431_v28, %v2263_v38  ;;  %v2562_v54 = vpop.f32.mrb[24].mxu1  ;;  %v2564_v49 = vpop.f32.mrb[25].mxu0 }
 0x11f   : > { %v1958_v22 = vpop.eup %1957  ;;  %v948_v26 = vmul.f32 0.5, %v1956_v8  ;;  %1977 = vtanh.f32 %v859_v42  ;;  %v2556_v27 = vmul.f32 0.5, %v2543_v17  ;;  %v2560_v14 = vadd.f32 %v2263_v38, %v2433_v31  ;;  %v2570_v41 = vpop.f32.mrb[25].mxu1 }
 0x120   : > { %v1960_v33 = vpop.eup %1959  ;;  %v1110_v28 = vmul.f32 %v1046_v48, %v2340_v35  ;;  %v980_v34 = vmul.f32 0.5, %v1958_v22  ;;  %1979 = vtanh.f32 %v825_v45  ;;  %v2568_v36 = vmul.f32 0.5, %v2547_v19  ;;  %v2572_v37 = vpop.f32.mrb[26].mxu0 }
 0x121   : > { %v1962_v50 = vpop.eup %1961  ;;  %v1012_v46 = vadd.f32 0.5, %v948_v26  ;;  %v951_v31 = vmul.f32 0.5, %v1960_v33  ;;  %1981 = vtanh.f32 %v857_v13  ;;  %v2575_v52 = vmul.f32 0.5, %v2551_v9  ;;  %v2577_v53 = vpop.f32.mrb[26].mxu1 }
 0x122   : > { %v2579_v35 = vpop.f32.mrb[27].mxu0  ;;  %v1964_v60 = vpop.eup %1963  ;;  %v1714_v24 = vpack.c.bf16 %v1110_v28, %v1110_v28  ;;  %v1044_v63 = vadd.f32 0.5, %v980_v34  ;;  %v983_v32 = vmul.f32 0.5, %v1962_v50  ;;  %1983 = vtanh.f32 %v830_v4 }
 0x123   : > { %v2581_v2 = vpop.f32.mrb[27].mxu1  ;;  %v1966_v42 = vpop.eup %1965  ;;  %v1076_v11 = vmul.f32 %v1012_v46, %v2418_v25  ;;  %v1015_v45 = vadd.f32 0.5, %v951_v31  ;;  %v949_v57 = vmul.f32 0.5, %v1964_v60  ;;  %1985 = vtanh.f32 %v862_v44 }
 0x124   : > { %v1968_v13 = vpop.eup %1967  ;;  %1431 = vst.msk [vmem:[%s2358_s10 + $0xa8] sm:$0xf] %vm1388_vm3, %v1714_v24  ;;  %v1108_v8 = vmul.f32 %v1044_v63, %v2429_v18  ;;  %v1047_v48 = vadd.f32 0.5, %v983_v32  ;;  %v981_v22 = vmul.f32 0.5, %v1966_v42  ;;  %1987 = vtanh.f32 %v828_v15 }
 0x125   : > { %v1970_v26 = vpop.eup %1969  ;;  %v1680_v33 = vpack.c.bf16 %v1076_v11, %v1076_v11  ;;  %v1079_v4 = vmul.f32 %v1015_v45, %v2441_v20  ;;  %v1013_v28 = vadd.f32 0.5, %v949_v57  ;;  %v954_v34 = vmul.f32 0.5, %v1968_v13  ;;  %v2589_v60 = vpop.f32.mrb[28].mxu0 }
 0x126   : > { %v1972_v25 = vpop.eup %1971  ;;  %v1712_v50 = vpack.c.bf16 %v1108_v8, %v1108_v8  ;;  %v1111_v44 = vmul.f32 %v1047_v48, %v2450_v55  ;;  %v1045_v46 = vadd.f32 0.5, %v981_v22  ;;  %v986_v31 = vmul.f32 0.5, %v1970_v26  ;;  %v2594_v32 = vpop.f32.mrb[28].mxu1 }
 0x127   : > { %v1974_v18 = vpop.eup %1973  ;;  %1397 = vst.msk [vmem:[%s2358_s10 + $0x20] sm:$0xf] %vm1388_vm3, %v1680_v33  ;;  %v1683_v15 = vpack.c.bf16 %v1079_v4, %v1079_v4  ;;  %v1077_v24 = vmul.f32 %v1013_v28, %v2454_v29  ;;  %v1018_v63 = vadd.f32 0.5, %v954_v34  ;;  %v952_v20 = vmul.f32 0.5, %v1972_v25  ;;  %v2596_v42 = vpop.f32.mrb[29].mxu0 }
 0x128   : > { %v1976_v11 = vpop.eup %1975  ;;  %1429 = vst.msk [vmem:[%s2358_s10 + $0xa0] sm:$0xf] %vm1388_vm3, %v1712_v50  ;;  %v1715_v55 = vpack.c.bf16 %v1111_v44, %v1111_v44  ;;  %v1109_v45 = vmul.f32 %v1045_v46, %v2461_v51  ;;  %v1050_v57 = vadd.f32 0.5, %v986_v31  ;;  %v984_v13 = vmul.f32 0.5, %v1974_v18  ;;  %v2601_v8 = vpop.f32.mrb[29].mxu1 }
 0x129   : > { %v2603_v48 = vpop.f32.mrb[30].mxu0  ;;  %v1978_v29 = vpop.eup %1977  ;;  %1400 = vst.msk [vmem:[%s2358_s10 + $0x2c] sm:$0xf] %vm1388_vm3, %v1683_v15  ;;  %v1681_v22 = vpack.c.bf16 %v1077_v24, %v1077_v24  ;;  %v1082_v26 = vmul.f32 %v1018_v63, %v2469_v47  ;;  %v1016_v33 = vadd.f32 0.5, %v952_v20  ;;  %v955_v4 = vmul.f32 0.5, %v1976_v11 }
 0x12a   : > { %v2608_v28 = vpop.f32.mrb[30].mxu1  ;;  %v2610_v34 = vpop.f32.mrb[31].mxu0  ;;  %1432 = vst.msk [vmem:[%s2358_s10 + $0xac] sm:$0xf] %vm1388_vm3, %v1715_v55  ;;  %v1713_v25 = vpack.c.bf16 %v1109_v45, %v1109_v45  ;;  %v1114_v50 = vmul.f32 %v1050_v57, %v2476_v56  ;;  %v1048_v44 = vadd.f32 0.5, %v984_v13  ;;  %v987_v46 = vmul.f32 0.5, %v1978_v29 }
 0x12b   : > { %v1980_v51 = vpop.eup %1979  ;;  %v2615_v31 = vpop.f32.mrb[31].mxu1  ;;  %1398 = vst.msk [vmem:[%s2358_s10 + $0x24] sm:$0xf] %vm1388_vm3, %v1681_v22  ;;  %v1686_v47 = vpack.c.bf16 %v1082_v26, %v1082_v26  ;;  %v1080_v15 = vmul.f32 %v1016_v33, %v2480_v58  ;;  %v1019_v24 = vadd.f32 0.5, %v955_v4  ;;  %1989 = vtanh.f32 %v2556_v27 }
 0x12c   : > { %v1982_v18 = vpop.eup %1981  ;;  %v953_v63 = vmul.f32 0.5, %v1980_v51  ;;  %1430 = vst.msk [vmem:[%s2358_s10 + $0xa4] sm:$0xf] %vm1388_vm3, %v1713_v25  ;;  %v1718_v11 = vpack.c.bf16 %v1114_v50, %v1114_v50  ;;  %v1112_v56 = vmul.f32 %v1048_v44, %v2487_v16  ;;  %v1051_v55 = vadd.f32 0.5, %v987_v46 }
 0x12d   : > { %v1984_v20 = vpop.eup %1983  ;;  %v985_v45 = vmul.f32 0.5, %v1982_v18  ;;  %1403 = vst.msk [vmem:[%s2358_s10 + $0x38] sm:$0xf] %vm1388_vm3, %v1686_v47  ;;  %v1684_v13 = vpack.c.bf16 %v1080_v15, %v1080_v15  ;;  %v1083_v29 = vmul.f32 %v1019_v24, %v2491_v61  ;;  %1991 = vtanh.f32 %v2568_v36 }
 0x12e   : > { %v1986_v57 = vpop.eup %1985  ;;  %v1017_v58 = vadd.f32 0.5, %v953_v63  ;;  %v958_v22 = vmul.f32 0.5, %v1984_v20  ;;  %1435 = vst.msk [vmem:[%s2358_s10 + $0xb8] sm:$0xf] %vm1388_vm3, %v1718_v11  ;;  %v1716_v33 = vpack.c.bf16 %v1112_v56, %v1112_v56  ;;  %v1115_v4 = vmul.f32 %v1051_v55, %v2501_v1 }
 0x12f   : > { %v1988_v26 = vpop.eup %1987  ;;  %v1049_v51 = vadd.f32 0.5, %v985_v45  ;;  %v990_v16 = vmul.f32 0.5, %v1986_v57  ;;  %1401 = vst.msk [vmem:[%s2358_s10 + $0x30] sm:$0xf] %vm1388_vm3, %v1684_v13  ;;  %v1687_v25 = vpack.c.bf16 %v1083_v29, %v1083_v29  ;;  %1993 = vtanh.f32 %v2575_v52 }
 0x130   : > { %v1081_v50 = vmul.f32 %v1017_v58, %v2511_v5  ;;  %v1022_v44 = vadd.f32 0.5, %v958_v22  ;;  %v956_v46 = vmul.f32 0.5, %v1988_v26  ;;  %1433 = vst.msk [vmem:[%s2358_s10 + $0xb0] sm:$0xf] %vm1388_vm3, %v1716_v33  ;;  %v1719_v61 = vpack.c.bf16 %v1115_v4, %v1115_v4 }
 0x131   : > { %v1113_v18 = vmul.f32 %v1049_v51, %v2520_v7  ;;  %v1054_v47 = vadd.f32 0.5, %v990_v16  ;;  %1404 = vst.msk [vmem:[%s2358_s10 + $0x3c] sm:$0xf] %vm1388_vm3, %v1687_v25  ;;  %v829_v7 = vmul.f32 0.5, %v2560_v14  ;;  %v2654_v36 = vadd.f32 %v2482_v59, %v2263_v38 }
 0x132   : > { %v1685_v1 = vpack.c.bf16 %v1081_v50, %v1081_v50  ;;  %v1086_v15 = vmul.f32 %v1022_v44, %v2524_v10  ;;  %v1020_v24 = vadd.f32 0.5, %v956_v46  ;;  %1436 = vst.msk [vmem:[%s2358_s10 + $0xbc] sm:$0xf] %vm1388_vm3, %v1719_v61  ;;  %v2650_v10 = vadd.f32 %v2263_v38, %v2443_v39 }
 0x133   : > { %v1717_v5 = vpack.c.bf16 %v1113_v18, %v1113_v18  ;;  %v1118_v63 = vmul.f32 %v1054_v47, %v2531_v12  ;;  %1995 = vtanh.f32 %v829_v7  ;;  %v2660_v52 = vadd.f32 %v2493_v62, %v2263_v38 }
 0x134   : > { %1402 = vst.msk [vmem:[%s2358_s10 + $0x34] sm:$0xf] %vm1388_vm3, %v1685_v1  ;;  %v1690_v27 = vpack.c.bf16 %v1086_v15, %v1086_v15  ;;  %v1084_v20 = vmul.f32 %v1020_v24, %v2535_v43  ;;  %v2664_v43 = vadd.f32 %v2263_v38, %v2495_v23  ;;  %v861_v11 = vmul.f32 0.5, %v2650_v10 }
 0x135   : > { %1434 = vst.msk [vmem:[%s2358_s10 + $0xb4] sm:$0xf] %vm1388_vm3, %v1717_v5  ;;  %v1722_v12 = vpack.c.bf16 %v1118_v63, %v1118_v63  ;;  %v834_v59 = vmul.f32 0.5, %v2654_v36  ;;  %v2672_v56 = vadd.f32 %v2263_v38, %v2503_v0  ;;  %v866_v62 = vmul.f32 0.5, %v2660_v52 }
 0x136   : > { %1407 = vst.msk [vmem:[%s2358_s10 + $0x48] sm:$0xf] %vm1388_vm3, %v1690_v27  ;;  %v1688_v39 = vpack.c.bf16 %v1084_v20, %v1084_v20  ;;  %v832_v55 = vmul.f32 0.5, %v2664_v43  ;;  %v2680_v23 = vadd.f32 %v2505_v30, %v2263_v38  ;;  %v2684_v45 = vadd.f32 %v2513_v6, %v2263_v38 }
 0x137   : > { %1439 = vst.msk [vmem:[%s2358_s10 + $0xc8] sm:$0xf] %vm1388_vm3, %v1722_v12  ;;  %1997 = vtanh.f32 %v861_v11  ;;  %v864_v0 = vmul.f32 0.5, %v2672_v56  ;;  %v2691_v57 = vadd.f32 %v2263_v38, %v2515_v40  ;;  %v2695_v13 = vadd.f32 %v2263_v38, %v2526_v3  ;;  %v1990_v3 = vpop.eup %1989 }
 0x138   : > { %1405 = vst.msk [vmem:[%s2358_s10 + $0x40] sm:$0xf] %vm1388_vm3, %v1688_v39  ;;  %1999 = vtanh.f32 %v834_v59  ;;  %v835_v30 = vmul.f32 0.5, %v2680_v23  ;;  %v867_v29 = vmul.f32 0.5, %v2684_v45  ;;  %v2701_v6 = vadd.f32 %v2553_v21, %v2263_v38  ;;  %v1992_v4 = vpop.eup %1991 }
 0x139   : > { %2001 = vtanh.f32 %v866_v62  ;;  %v833_v58 = vmul.f32 0.5, %v2691_v57  ;;  %v865_v22 = vmul.f32 0.5, %v2695_v13  ;;  %v2707_v40 = vadd.f32 %v2562_v54, %v2263_v38  ;;  %v1994_v25 = vpop.eup %1993 }
 0x13a   : > { %2003 = vtanh.f32 %v832_v55  ;;  %v838_v26 = vmul.f32 0.5, %v2701_v6  ;;  %v2712_v33 = vadd.f32 %v2263_v38, %v2564_v49  ;;  %v2716_v21 = vadd.f32 %v2263_v38, %v2570_v41 }
 0x13b   : > { %v988_v51 = vmul.f32 0.5, %v1990_v3  ;;  %2005 = vtanh.f32 %v864_v0  ;;  %v870_v16 = vmul.f32 0.5, %v2707_v40  ;;  %v2721_v54 = vadd.f32 %v2572_v37, %v2263_v38 }
 0x13c   : > { %v959_v50 = vmul.f32 0.5, %v1992_v4  ;;  %2007 = vtanh.f32 %v835_v30  ;;  %v836_v44 = vmul.f32 0.5, %v2712_v33  ;;  %v868_v49 = vmul.f32 0.5, %v2716_v21 }
 0x13d   : > { %v1052_v46 = vadd.f32 0.5, %v988_v51  ;;  %v991_v61 = vmul.f32 0.5, %v1994_v25  ;;  %2009 = vtanh.f32 %v867_v29  ;;  %v839_v41 = vmul.f32 0.5, %v2721_v54  ;;  %v1996_v18 = vpop.eup %1995 }
 0x13e   : > { %v1023_v47 = vadd.f32 0.5, %v959_v50  ;;  %2011 = vtanh.f32 %v833_v58  ;;  %v2728_v1 = vadd.f32 %v2577_v53, %v2263_v38  ;;  %v2732_v37 = vadd.f32 %v2263_v38, %v2579_v35 }
 0x13f   : > { %v1116_v15 = vmul.f32 %v1052_v46, %v2543_v17  ;;  %v1055_v24 = vadd.f32 0.5, %v991_v61  ;;  %v957_v5 = vmul.f32 0.5, %v1996_v18  ;;  %2013 = vtanh.f32 %v865_v22 }
 0x140   : > { %v1087_v63 = vmul.f32 %v1023_v47, %v2547_v19  ;;  %2015 = vtanh.f32 %v838_v26  ;;  %v871_v7 = vmul.f32 0.5, %v2728_v1  ;;  %v837_v27 = vmul.f32 0.5, %v2732_v37 }
 0x141   : > { %v1998_v20 = vpop.eup %1997  ;;  %v1720_v53 = vpack.c.bf16 %v1116_v15, %v1116_v15  ;;  %v1119_v12 = vmul.f32 %v1055_v24, %v2551_v9  ;;  %v1021_v35 = vadd.f32 0.5, %v957_v5  ;;  %2017 = vtanh.f32 %v870_v16 }
 0x142   : > { %v2000_v39 = vpop.eup %1999  ;;  %v1691_v17 = vpack.c.bf16 %v1087_v63, %v1087_v63  ;;  %v989_v11 = vmul.f32 0.5, %v1998_v20  ;;  %2019 = vtanh.f32 %v836_v44  ;;  %v2741_v19 = vadd.f32 %v2263_v38, %v2581_v2 }
 0x143   : > { %v2002_v59 = vpop.eup %2001  ;;  %1437 = vst.msk [vmem:[%s2358_s10 + $0xc0] sm:$0xf] %vm1388_vm3, %v1720_v53  ;;  %v1723_v62 = vpack.c.bf16 %v1119_v12, %v1119_v12  ;;  %v1085_v55 = vmul.f32 %v1021_v35, %v2560_v14  ;;  %v962_v0 = vmul.f32 0.5, %v2000_v39  ;;  %2021 = vtanh.f32 %v868_v49 }
 0x144   : > { %v2004_v9 = vpop.eup %2003  ;;  %1408 = vst.msk [vmem:[%s2358_s10 + $0x4c] sm:$0xf] %vm1388_vm3, %v1691_v17  ;;  %v1053_v30 = vadd.f32 0.5, %v989_v11  ;;  %v994_v29 = vmul.f32 0.5, %v2002_v59  ;;  %2023 = vtanh.f32 %v839_v41  ;;  %v869_v58 = vmul.f32 0.5, %v2741_v19 }
 0x145   : > { %v2006_v22 = vpop.eup %2005  ;;  %1440 = vst.msk [vmem:[%s2358_s10 + $0xcc] sm:$0xf] %vm1388_vm3, %v1723_v62  ;;  %v1689_v38 = vpack.c.bf16 %v1085_v55, %v1085_v55  ;;  %v1026_v2 = vadd.f32 0.5, %v962_v0  ;;  %v960_v3 = vmul.f32 0.5, %v2004_v9  ;;  %2025 = vtanh.f32 %v871_v7 }
 0x146   : > { %v2008_v26 = vpop.eup %2007  ;;  %v1117_v14 = vmul.f32 %v1053_v30, %v2650_v10  ;;  %v1058_v4 = vadd.f32 0.5, %v994_v29  ;;  %v992_v51 = vmul.f32 0.5, %v2006_v22  ;;  %2027 = vtanh.f32 %v837_v27 }
 0x147   : > { %v2010_v16 = vpop.eup %2009  ;;  %1406 = vst.msk [vmem:[%s2358_s10 + $0x44] sm:$0xf] %vm1388_vm3, %v1689_v38  ;;  %v1090_v25 = vmul.f32 %v1026_v2, %v2654_v36  ;;  %v1024_v50 = vadd.f32 0.5, %v960_v3  ;;  %v963_v44 = vmul.f32 0.5, %v2008_v26  ;;  %2029 = vtanh.f32 %v869_v58 }
 0x148   : > { %v2012_v49 = vpop.eup %2011  ;;  %v1721_v46 = vpack.c.bf16 %v1117_v14, %v1117_v14  ;;  %v1122_v61 = vmul.f32 %v1058_v4, %v2660_v52  ;;  %v1056_v41 = vadd.f32 0.5, %v992_v51  ;;  %v995_v18 = vmul.f32 0.5, %v2010_v16 }
 0x149   : > { %v2014_v10 = vpop.eup %2013  ;;  %v1694_v47 = vpack.c.bf16 %v1090_v25, %v1090_v25  ;;  %v1088_v15 = vmul.f32 %v1024_v50, %v2664_v43  ;;  %v1027_v24 = vadd.f32 0.5, %v963_v44  ;;  %v961_v5 = vmul.f32 0.5, %v2012_v49 }
 0x14a   : > { %v2016_v63 = vpop.eup %2015  ;;  %1438 = vst.msk [vmem:[%s2358_s10 + $0xc4] sm:$0xf] %vm1388_vm3, %v1721_v46  ;;  %v1726_v36 = vpack.c.bf16 %v1122_v61, %v1122_v61  ;;  %v1120_v7 = vmul.f32 %v1056_v41, %v2672_v56  ;;  %v1059_v27 = vadd.f32 0.5, %v995_v18  ;;  %v993_v20 = vmul.f32 0.5, %v2014_v10 }
 0x14b   : > { %v2018_v53 = vpop.eup %2017  ;;  %1411 = vst.msk [vmem:[%s2358_s10 + $0x58] sm:$0xf] %vm1388_vm3, %v1694_v47  ;;  %v1692_v52 = vpack.c.bf16 %v1088_v15, %v1088_v15  ;;  %v1091_v12 = vmul.f32 %v1027_v24, %v2680_v23  ;;  %v1025_v43 = vadd.f32 0.5, %v961_v5  ;;  %v966_v35 = vmul.f32 0.5, %v2016_v63 }
 0x14c   : > { %v2020_v39 = vpop.eup %2019  ;;  %1443 = vst.msk [vmem:[%s2358_s10 + $0xd8] sm:$0xf] %vm1388_vm3, %v1726_v36  ;;  %v1724_v17 = vpack.c.bf16 %v1120_v7, %v1120_v7  ;;  %v1123_v11 = vmul.f32 %v1059_v27, %v2684_v45  ;;  %v1057_v56 = vadd.f32 0.5, %v993_v20  ;;  %v998_v59 = vmul.f32 0.5, %v2018_v53 }
 0x14d   : > { %v2022_v62 = vpop.eup %2021  ;;  %1409 = vst.msk [vmem:[%s2358_s10 + $0x50] sm:$0xf] %vm1388_vm3, %v1692_v52  ;;  %v1695_v55 = vpack.c.bf16 %v1091_v12, %v1091_v12  ;;  %v1089_v0 = vmul.f32 %v1025_v43, %v2691_v57  ;;  %v1030_v23 = vadd.f32 0.5, %v966_v35  ;;  %v964_v9 = vmul.f32 0.5, %v2020_v39 }
 0x14e   : > { %v2024_v30 = vpop.eup %2023  ;;  %1441 = vst.msk [vmem:[%s2358_s10 + $0xd0] sm:$0xf] %vm1388_vm3, %v1724_v17  ;;  %v1727_v29 = vpack.c.bf16 %v1123_v11, %v1123_v11  ;;  %v1121_v58 = vmul.f32 %v1057_v56, %v2695_v13  ;;  %v1062_v45 = vadd.f32 0.5, %v998_v59  ;;  %v996_v22 = vmul.f32 0.5, %v2022_v62 }
 0x14f   : > { %v2026_v38 = vpop.eup %2025  ;;  %1412 = vst.msk [vmem:[%s2358_s10 + $0x5c] sm:$0xf] %vm1388_vm3, %v1695_v55  ;;  %v1693_v2 = vpack.c.bf16 %v1089_v0, %v1089_v0  ;;  %v1094_v3 = vmul.f32 %v1030_v23, %v2701_v6  ;;  %v1028_v57 = vadd.f32 0.5, %v964_v9  ;;  %v967_v26 = vmul.f32 0.5, %v2024_v30 }
 0x150   : > { %v2028_v14 = vpop.eup %2027  ;;  %1444 = vst.msk [vmem:[%s2358_s10 + $0xdc] sm:$0xf] %vm1388_vm3, %v1727_v29  ;;  %v1725_v4 = vpack.c.bf16 %v1121_v58, %v1121_v58  ;;  %v1126_v51 = vmul.f32 %v1062_v45, %v2707_v40  ;;  %v1060_v13 = vadd.f32 0.5, %v996_v22  ;;  %v999_v16 = vmul.f32 0.5, %v2026_v38 }
 0x151   : > { %v2030_v25 = vpop.eup %2029  ;;  %1410 = vst.msk [vmem:[%s2358_s10 + $0x54] sm:$0xf] %vm1388_vm3, %v1693_v2  ;;  %v1698_v50 = vpack.c.bf16 %v1094_v3, %v1094_v3  ;;  %v1092_v44 = vmul.f32 %v1028_v57, %v2712_v33  ;;  %v1031_v49 = vadd.f32 0.5, %v967_v26  ;;  %v965_v6 = vmul.f32 0.5, %v2028_v14  ;;  %v2047_v33 = vld [vmem:[%s2885_s2] ss:$0 sm:$0xff] }
 0x152   : > { %1442 = vst.msk [vmem:[%s2358_s10 + $0xd4] sm:$0xf] %vm1388_vm3, %v1725_v4  ;;  %v1730_v46 = vpack.c.bf16 %v1126_v51, %v1126_v51  ;;  %v1124_v61 = vmul.f32 %v1060_v13, %v2716_v21  ;;  %v1063_v41 = vadd.f32 0.5, %v999_v16  ;;  %v997_v18 = vmul.f32 0.5, %v2030_v25 }
 0x153   : > { %1415 = vst.msk [vmem:[%s2358_s10 + $0x68] sm:$0xf] %vm1388_vm3, %v1698_v50  ;;  %v1696_v40 = vpack.c.bf16 %v1092_v44, %v1092_v44  ;;  %v1095_v10 = vmul.f32 %v1031_v49, %v2721_v54  ;;  %v1029_v47 = vadd.f32 0.5, %v965_v6  ;;  %v678_v15 = vadd.f32 %v2047_v33, %v2589_v60 }
 0x154   : > { %1447 = vst.msk [vmem:[%s2358_s10 + $0xe8] sm:$0xf] %vm1388_vm3, %v1730_v46  ;;  %v1728_v24 = vpack.c.bf16 %v1124_v61, %v1124_v61  ;;  %v1127_v21 = vmul.f32 %v1063_v41, %v2728_v1  ;;  %v1061_v5 = vadd.f32 0.5, %v997_v18  ;;  %v806_v63 = vadd.f32 %v2047_v33, %v2594_v32 }
 0x155   : > { %1413 = vst.msk [vmem:[%s2358_s10 + $0x60] sm:$0xf] %vm1388_vm3, %v1696_v40  ;;  %v1699_v54 = vpack.c.bf16 %v1095_v10, %v1095_v10  ;;  %v1093_v36 = vmul.f32 %v1029_v47, %v2732_v37  ;;  %v842_v7 = vmul.f32 0.5, %v678_v15  ;;  %v670_v27 = vadd.f32 %v2047_v33, %v2596_v42 }
 0x156   : > { %1445 = vst.msk [vmem:[%s2358_s10 + $0xe0] sm:$0xf] %vm1388_vm3, %v1728_v24  ;;  %v1731_v60 = vpack.c.bf16 %v1127_v21, %v1127_v21  ;;  %v1125_v20 = vmul.f32 %v1061_v5, %v2741_v19  ;;  %v874_v53 = vmul.f32 0.5, %v806_v63  ;;  %v798_v1 = vadd.f32 %v2047_v33, %v2601_v8 }
 0x157   : > { %1416 = vst.msk [vmem:[%s2358_s10 + $0x6c] sm:$0xf] %vm1388_vm3, %v1699_v54  ;;  %v1697_v32 = vpack.c.bf16 %v1093_v36, %v1093_v36  ;;  %2031 = vtanh.f32 %v842_v7  ;;  %v840_v52 = vmul.f32 0.5, %v670_v27  ;;  %v681_v37 = vadd.f32 %v2047_v33, %v2603_v48 }
 0x158   : > { %1448 = vst.msk [vmem:[%s2358_s10 + $0xec] sm:$0xf] %vm1388_vm3, %v1731_v60  ;;  %v1729_v42 = vpack.c.bf16 %v1125_v20, %v1125_v20  ;;  %2033 = vtanh.f32 %v874_v53  ;;  %v872_v12 = vmul.f32 0.5, %v798_v1  ;;  %v809_v43 = vadd.f32 %v2047_v33, %v2608_v28 }
 0x159   : > { %1414 = vst.msk [vmem:[%s2358_s10 + $0x64] sm:$0xf] %vm1388_vm3, %v1697_v32  ;;  %2035 = vtanh.f32 %v840_v52  ;;  %v843_v19 = vmul.f32 0.5, %v681_v37  ;;  %v673_v8 = vadd.f32 %v2047_v33, %v2610_v34  ;;  %v801_v35 = vadd.f32 %v2047_v33, %v2615_v31 }
 0x15a   : > { %1446 = vst.msk [vmem:[%s2358_s10 + $0xe4] sm:$0xf] %vm1388_vm3, %v1729_v42  ;;  %2037 = vtanh.f32 %v872_v12  ;;  %v875_v39 = vmul.f32 0.5, %v809_v43 }
 0x15b   : > { %2039 = vtanh.f32 %v843_v19  ;;  %v841_v48 = vmul.f32 0.5, %v673_v8  ;;  %v873_v17 = vmul.f32 0.5, %v801_v35 }
 0x15c   : > { %2041 = vtanh.f32 %v875_v39 }
 0x15d   : > { %2043 = vtanh.f32 %v841_v48 }
 0x15e   : > { %2045 = vtanh.f32 %v873_v17 }
 0x161   : > { %v2032_v11 = vpop.eup %2031 }
 0x162   : > { %v2034_v28 = vpop.eup %2033  ;;  %v970_v56 = vmul.f32 0.5, %v2032_v11 }
 0x163   : > { %v2036_v59 = vpop.eup %2035  ;;  %v1002_v62 = vmul.f32 0.5, %v2034_v28 }
 0x164   : > { %v2038_v55 = vpop.eup %2037  ;;  %v1034_v0 = vadd.f32 0.5, %v970_v56  ;;  %v968_v34 = vmul.f32 0.5, %v2036_v59 }
 0x165   : > { %v2040_v23 = vpop.eup %2039  ;;  %v1066_v31 = vadd.f32 0.5, %v1002_v62  ;;  %v1000_v9 = vmul.f32 0.5, %v2038_v55 }
 0x166   : > { %v2042_v30 = vpop.eup %2041  ;;  %v1098_v29 = vmul.f32 %v1034_v0, %v678_v15  ;;  %v1032_v58 = vadd.f32 0.5, %v968_v34  ;;  %v971_v45 = vmul.f32 0.5, %v2040_v23 }
 0x167   : > { %v2044_v22 = vpop.eup %2043  ;;  %v1130_v38 = vmul.f32 %v1066_v31, %v806_v63  ;;  %v1064_v2 = vadd.f32 0.5, %v1000_v9  ;;  %v1003_v3 = vmul.f32 0.5, %v2042_v30 }
 0x168   : > { %v2046_v57 = vpop.eup %2045  ;;  %v1702_v26 = vpack.c.bf16 %v1098_v29, %v1098_v29  ;;  %v1096_v14 = vmul.f32 %v1032_v58, %v670_v27  ;;  %v1035_v4 = vadd.f32 0.5, %v971_v45  ;;  %v969_v51 = vmul.f32 0.5, %v2044_v22 }
 0x169   : > { %v1734_v13 = vpack.c.bf16 %v1130_v38, %v1130_v38  ;;  %v1128_v16 = vmul.f32 %v1064_v2, %v798_v1  ;;  %v1067_v25 = vadd.f32 0.5, %v1003_v3  ;;  %v1001_v50 = vmul.f32 0.5, %v2046_v57 }
 0x16a   : > { %1419 = vst.msk [vmem:[%s2358_s10 + $0x78] sm:$0xf] %vm1388_vm3, %v1702_v26  ;;  %v1700_v44 = vpack.c.bf16 %v1096_v14, %v1096_v14  ;;  %v1099_v49 = vmul.f32 %v1035_v4, %v681_v37  ;;  %v1033_v6 = vadd.f32 0.5, %v969_v51 }
 0x16b   : > { %1451 = vst.msk [vmem:[%s2358_s10 + $0xf8] sm:$0xf] %vm1388_vm3, %v1734_v13  ;;  %v1732_v46 = vpack.c.bf16 %v1128_v16, %v1128_v16  ;;  %v1131_v61 = vmul.f32 %v1067_v25, %v809_v43  ;;  %v1065_v41 = vadd.f32 0.5, %v1001_v50 }
 0x16c   : > { %1417 = vst.msk [vmem:[%s2358_s10 + $0x70] sm:$0xf] %vm1388_vm3, %v1700_v44  ;;  %v1703_v18 = vpack.c.bf16 %v1099_v49, %v1099_v49  ;;  %v1097_v40 = vmul.f32 %v1033_v6, %v673_v8 }
 0x16d   : > { %1449 = vst.msk [vmem:[%s2358_s10 + $0xf0] sm:$0xf] %vm1388_vm3, %v1732_v46  ;;  %v1735_v10 = vpack.c.bf16 %v1131_v61, %v1131_v61  ;;  %v1129_v47 = vmul.f32 %v1065_v41, %v801_v35 }
 0x16e   : > { %1420 = vst.msk [vmem:[%s2358_s10 + $0x7c] sm:$0xf] %vm1388_vm3, %v1703_v18  ;;  %v1701_v33 = vpack.c.bf16 %v1097_v40, %v1097_v40 }
 0x16f   : > { %1452 = vst.msk [vmem:[%s2358_s10 + $0xfc] sm:$0xf] %vm1388_vm3, %v1735_v10  ;;  %v1733_v15 = vpack.c.bf16 %v1129_v47, %v1129_v47 }
 0x170   : > { %1418 = vst.msk [vmem:[%s2358_s10 + $0x74] sm:$0xf] %vm1388_vm3, %v1701_v33 }
 0x171   : > { %1450 = vst.msk [vmem:[%s2358_s10 + $0xf4] sm:$0xf] %vm1388_vm3, %v1733_v15 }
 0x172   : > { %2061 = shalt.err (!%p2058_p3)
}
 0x173   : > { %s2062_s4 = scalar_lea.hbm %s2830_s26, 4096  ;;  %s2066_s7 = scalar_lea.hbm %s2886_s3, 36864 }
 0x174   : > { %p2063_p4 = scmp.ne.s32.totalorder %s2830_s26, %s2062_s4  ;;  %p2067_p9 = scmp.lt.u32.totalorder %s2830_s26, %s2886_s3 }
 0x175   : > { %p2068_p10 = scmp.lt.u32.totalorder %s2066_s7, %s2062_s4  ;;  %p2070_p12 = scmp.lt.u32.totalorder %s2062_s4, %s2830_s26 }
 0x176   : > { %p2064_p7 = pnand %p2063_p4, %p2174_p5 }
 0x177   : > { %p2069_p11 = por %p2068_p10, %p2067_p9 }
 0x178   : > { %p2065_p8 = pneg %p2064_p7 }
 0x179   : > { %p2071_p13 = por %p2070_p12, %p2069_p11 }
 0x17b   : > { %p2072_p0 = pnand %p2071_p13, %p2065_p8 }
 0x17d   : > { %2075 = shalt.err (!%p2072_p0)
}
 0x17e   : > { %s2114_s10 = smov 64   ;;  %s2115_s11 = smov 4  }
 0x17f   : > { %1843 = dma.vmem_to_hbm [thread:$0]  (%p2174_p5), %s2832_s20, 4096, %s2830_s26, %s2842_s16, %s2114_s10, %s2114_s10, %s2115_s11  }
 0x180 PF: > { %p1849_p1 = scmp.ge.s32.totalorder %s2110_s15, 2  ;;  %s1482_s17 = sand.u32 1, %s2098_s12  }
 0x181   : > { %s1483_s19 = scalar_lea.sflag [#allocation3], %s1482_s17 }
 0x182   : > { %p1846_p2 = pnand %p1849_p1, %p2178_p6 }
 0x184   : > { %2093 = dma.done.wait (!%p1846_p2), %s1483_s19, 4096  }
 0x185   : > { %2095 = vsyncadd (!%p1846_p2), %s1483_s19, 4294963200  ;;  %p13_p3 = scmp.ge.s32.totalorder %s2161_s18, 11   ;;  %s2889_s12 = smov %s2102_s13 }
 0x186   : > { %s2890_s13 = smov %s2106_s14  ;;  %s2891_s14 = smov %s2172_s21 }
 0x187   : > { %s2892_s15 = smov %s2161_s18  ;;  %15 = sbr.rel (!%p13_p3) target bundleno = 3 (0x3), region = 67 }
 0x18e   :  { %1488 = vsyncpa [#allocation3], 1 }
 0x18f   :  { %1490 = vsyncpa [#allocation3 + $0x1], 1 }

</bundles_post_ra>
